<compile_context>
chip_gen: v7x
topology: tpu7x:2x2x1
jax: 0.10.0
libtpu: 0.0.40
codegen_flags: <defaults>
</compile_context>

<pallas_src>
from typing import NamedTuple

import jax
import jax.numpy as jnp
from jax.experimental import pallas as pl
from jax.experimental.pallas import tpu as pltpu


def _round_up(n, m):
    return -(-n // m) * m


def _qnet_kernel(x_ref, w1_ref, b1_ref, w2_ref, b2_ref, w3_ref, b3_ref, o_ref):
    # fc1 + relu1  (bf16 MXU operands -> f32 accumulation; x cast in-kernel)
    x = x_ref[...].astype(w1_ref.dtype)
    h1 = jnp.dot(x, w1_ref[...], preferred_element_type=jnp.float32)
    h1 = jnp.maximum(h1 + b1_ref[...], 0.0)
    # fc2 + relu2
    h2 = jnp.dot(h1.astype(w2_ref.dtype), w2_ref[...],
                 preferred_element_type=jnp.float32)
    h2 = jnp.maximum(h2 + b2_ref[...], 0.0)
    # logits (lane-padded output -> full-width MXU pass + unmasked lane-dense store)
    logits = jnp.dot(h2.astype(w3_ref.dtype), w3_ref[...],
                     preferred_element_type=jnp.float32)
    o_ref[...] = (logits + b3_ref[...]).astype(o_ref.dtype)


class PreparedQNetParams(NamedTuple):
    """Weights pre-cast/padded for the kernel (do this once per param update)."""
    w1: jax.Array   # (S,  H1)    compute_dtype
    b1: jax.Array   # (1,  H1)    f32
    w2: jax.Array   # (H1, H2)    compute_dtype
    b2: jax.Array   # (1,  H2)    f32
    w3: jax.Array   # (H2, A_pad) compute_dtype (lane-padded)
    b3: jax.Array   # (1,  A_pad) f32           (lane-padded)
    action_size: int


def prepare_qnetwork_params(params, compute_dtype=jnp.bfloat16):
    """Hoisted padding/casting: call once per parameter update, not per forward."""
    w1, b1, w2, b2, w3, b3 = params
    H1 = w1.shape[1]
    H2 = w2.shape[1]
    A = w3.shape[1]
    # Lane-pad the output (action) dimension to a multiple of 128.
    A_pad = max(128, _round_up(A, 128))
    w3_p = jnp.pad(w3, ((0, 0), (0, A_pad - A))) if A_pad != A else w3
    b3_p = jnp.pad(b3, ((0, A_pad - A),)) if A_pad != A else b3
    return PreparedQNetParams(
        w1=w1.astype(compute_dtype),
        b1=b1.astype(jnp.float32).reshape(1, H1),
        w2=w2.astype(compute_dtype),
        b2=b2.astype(jnp.float32).reshape(1, H2),
        w3=w3_p.astype(compute_dtype),
        b3=b3_p.astype(jnp.float32).reshape(1, A_pad),
        action_size=A,
    )


def _default_batch_tile(batch):
    """MXU-friendly batch tile.

    Small batches (< 64): one tile covering the (8-rounded) batch.
    Larger batches: split into >= 2 grid steps so dimension_semantics=("parallel",)
    can shard across v7x's two TensorCores, while keeping tiles up to 1024 rows so
    single-TC chips (v5e/v6e) don't pay per-grid-step overhead many times over.
    """
    if batch < 64:
        return _round_up(batch, 8)
    return min(_round_up(-(-batch // 2), 8), 1024)


def qnetwork_forward(x, prepared: PreparedQNetParams, *, batch_tile=None,
                     out_dtype=None):
    """Fused 3-layer MLP forward pass in a single Pallas kernel, tiled over batch."""
    B, S = x.shape
    H1 = prepared.w1.shape[1]
    H2 = prepared.w2.shape[1]
    A_pad = prepared.w3.shape[1]
    A = prepared.action_size
    if out_dtype is None:
        out_dtype = x.dtype

    if batch_tile is None:
        batch_tile = _default_batch_tile(B)
    batch_tile = _round_up(batch_tile, 8)

    # Pad batch so the batch tile evenly divides it (x stays f32; cast is in-kernel).
    pad_b = (-B) % batch_tile
    x_p = jnp.pad(x, ((0, pad_b), (0, 0))) if pad_b else x
    Bp = B + pad_b
    grid = (Bp // batch_tile,)

    w_bytes = (S * H1 + H1 * H2 + H2 * A_pad) * prepared.w1.dtype.itemsize
    b_bytes = (H1 + H2 + A_pad) * 4
    cost = pl.CostEstimate(
        flops=2 * Bp * (S * H1 + H1 * H2 + H2 * A_pad),
        transcendentals=0,
        bytes_accessed=Bp * S * x.dtype.itemsize + w_bytes + b_bytes
        + Bp * A_pad * jnp.dtype(jnp.bfloat16).itemsize,
    )

    out = pl.pallas_call(
        _qnet_kernel,
        # bf16 output: operands are already bf16, so this is accuracy-free and
        # halves the (lane-padded) HBM writeback + the wrapper slice's re-read.
        out_shape=jax.ShapeDtypeStruct((Bp, A_pad), jnp.bfloat16),
        grid_spec=pltpu.PrefetchScalarGridSpec(
            num_scalar_prefetch=0,
            grid=grid,
            in_specs=[
                pl.BlockSpec((batch_tile, S), lambda i: (i, 0)),    # x tile (f32)
                pl.BlockSpec((S, H1), lambda i: (0, 0)),            # W1 (resident)
                pl.BlockSpec((1, H1), lambda i: (0, 0)),            # b1
                pl.BlockSpec((H1, H2), lambda i: (0, 0)),           # W2
                pl.BlockSpec((1, H2), lambda i: (0, 0)),            # b2
                pl.BlockSpec((H2, A_pad), lambda i: (0, 0)),        # W3 (lane-padded)
                pl.BlockSpec((1, A_pad), lambda i: (0, 0)),         # b3
            ],
            out_specs=pl.BlockSpec((batch_tile, A_pad), lambda i: (i, 0)),
        ),
        compiler_params=pltpu.CompilerParams(
            dimension_semantics=("parallel",),
        ),
        cost_estimate=cost,
    )(x_p, prepared.w1, prepared.b1, prepared.w2, prepared.b2,
      prepared.w3, prepared.b3)

    # Slice off both batch padding and lane padding (keep this slice!).
    return out[:B, :A].astype(out_dtype)


def init_qnetwork_params(key, state_size, action_size,
                         layer_size1=512, layer_size2=256, dtype=jnp.float32):
    """Deterministic init mirroring nn.Linear's U(-1/sqrt(fan_in), 1/sqrt(fan_in)).

    Weights are returned in (in_features, out_features) layout (see layout note above).
    """
    sizes = [(state_size, layer_size1), (layer_size1, layer_size2),
             (layer_size2, action_size)]
    params = []
    keys = jax.random.split(key, 2 * len(sizes))
    for idx, (fan_in, fan_out) in enumerate(sizes):
        bound = 1.0 / (fan_in ** 0.5)
        w = jax.random.uniform(keys[2 * idx], (fan_in, fan_out),
                               minval=-bound, maxval=bound, dtype=dtype)
        b = jax.random.uniform(keys[2 * idx + 1], (fan_out,),
                               minval=-bound, maxval=bound, dtype=dtype)
        params.extend([w, b])
    return tuple(params)


def weighted_mse_loss(pred, target, weights):
    """Pure-JAX port of the module's weighted_mse_loss (host-side, not a kernel)."""
    out = (pred - target) ** 2 * weights
    return out.mean(0)


def _reference_forward(x, params):
    w1, b1, w2, b2, w3, b3 = params
    h1 = jnp.maximum(x @ w1 + b1, 0.0)
    h2 = jnp.maximum(h1 @ w2 + b2, 0.0)
    return h2 @ w3 + b3


if __name__ == "__main__":
    # Small, forward-consistent shapes: batch=8 states of dim 16, 4 actions.
    batch, state_size, action_size = 8, 16, 4
    layer_size1, layer_size2 = 512, 256

    key = jax.random.PRNGKey(0)
    k_params, k_x, k_x2 = jax.random.split(key, 3)
    params = init_qnetwork_params(k_params, state_size, action_size,
                                  layer_size1, layer_size2)
    # Hoisted: pad/cast the weights once (per parameter update), not per forward.
    prepared = prepare_qnetwork_params(params)

    x = jax.random.normal(k_x, (batch, state_size), dtype=jnp.float32)
    q_values = jax.block_until_ready(qnetwork_forward(x, prepared))

    ref = _reference_forward(x, params)
    assert q_values.shape == (batch, action_size)
    # bf16 MXU operands / bf16 output with f32 accumulation -> loosened tolerance.
    assert jnp.allclose(q_values, ref, atol=5e-2, rtol=5e-2), "mismatch vs reference"

    # Second check: batch large enough to exercise >=2 grid steps + batch padding.
    x2 = jax.random.normal(k_x2, (200, state_size), dtype=jnp.float32)
    q2 = jax.block_until_ready(qnetwork_forward(x2, prepared))
    ref2 = _reference_forward(x2, params)
    assert q2.shape == (200, action_size)
    assert jnp.allclose(q2, ref2, atol=5e-2, rtol=5e-2), "mismatch vs reference (B=200)"

    # TODO(synk): optimize()/Adam training step, (weighted) MSE loss backward and
    # clone() have no forward-kernel equivalent; only inference forward is implemented.
    print("KERNEL_OK")
</pallas_src>

<mosaic_0001>
module attributes {stable_mosaic.version = 11 : i64} {
  func.func @_qnet_kernel(%arg0: i32, %arg1: memref<8x16xf32, #tpu.memory_space<vmem>>, %arg2: memref<16x512xbf16, #tpu.memory_space<vmem>>, %arg3: memref<1x512xf32, #tpu.memory_space<vmem>>, %arg4: memref<512x256xbf16, #tpu.memory_space<vmem>>, %arg5: memref<1x256xf32, #tpu.memory_space<vmem>>, %arg6: memref<256x128xbf16, #tpu.memory_space<vmem>>, %arg7: memref<1x128xf32, #tpu.memory_space<vmem>>, %arg8: memref<8x128xbf16, #tpu.memory_space<vmem>>) attributes {dimension_semantics = [#tpu.dimension_semantics<parallel>], iteration_bounds = array<i64: 1>, scalar_prefetch = 0 : i64, scratch_operands = 0 : i64, tpu.core_type = #tpu.core_type<tc>, window_params = [{transform_indices = @transform_0, window_bounds = array<i64: 8, 16>}, {pipeline_mode = #tpu.pipeline_mode<synchronous>, transform_indices = @transform_1, window_bounds = array<i64: 16, 512>}, {pipeline_mode = #tpu.pipeline_mode<synchronous>, transform_indices = @transform_2, window_bounds = array<i64: 1, 512>}, {pipeline_mode = #tpu.pipeline_mode<synchronous>, transform_indices = @transform_3, window_bounds = array<i64: 512, 256>}, {pipeline_mode = #tpu.pipeline_mode<synchronous>, transform_indices = @transform_4, window_bounds = array<i64: 1, 256>}, {pipeline_mode = #tpu.pipeline_mode<synchronous>, transform_indices = @transform_5, window_bounds = array<i64: 256, 128>}, {pipeline_mode = #tpu.pipeline_mode<synchronous>, transform_indices = @transform_6, window_bounds = array<i64: 1, 128>}, {transform_indices = @transform_7, window_bounds = array<i64: 8, 128>}]} {
    %c0 = arith.constant 0 : index
    %c0_0 = arith.constant 0 : index
    %0 = vector.load %arg1[%c0, %c0_0] : memref<8x16xf32, #tpu.memory_space<vmem>>, vector<8x16xf32>
    %1 = arith.truncf %0 : vector<8x16xf32> to vector<8x16xbf16>
    %c0_1 = arith.constant 0 : index
    %c0_2 = arith.constant 0 : index
    %2 = vector.load %arg2[%c0_1, %c0_2] : memref<16x512xbf16, #tpu.memory_space<vmem>>, vector<16x512xbf16>
    %cst = arith.constant dense<0.000000e+00> : vector<8x512xf32>
    %3 = tpu.matmul %1, %2, %cst {dimension_numbers = #tpu.dot_dimension_numbers<[1], [0], [0], [1], [0, 0, 1, 1], [], []>} : vector<8x16xbf16>, vector<16x512xbf16>, vector<8x512xf32> -> vector<8x512xf32>
    %c0_3 = arith.constant 0 : index
    %c0_4 = arith.constant 0 : index
    %4 = vector.load %arg3[%c0_3, %c0_4] : memref<1x512xf32, #tpu.memory_space<vmem>>, vector<1x512xf32>
    %5 = vector.broadcast %4 : vector<1x512xf32> to vector<8x512xf32>
    %6 = arith.addf %3, %5 : vector<8x512xf32>
    %cst_5 = arith.constant 0.000000e+00 : f32
    %7 = vector.broadcast %cst_5 : f32 to vector<8x512xf32>
    %8 = arith.maximumf %6, %7 : vector<8x512xf32>
    %9 = arith.truncf %8 : vector<8x512xf32> to vector<8x512xbf16>
    %c0_6 = arith.constant 0 : index
    %c0_7 = arith.constant 0 : index
    %10 = vector.load %arg4[%c0_6, %c0_7] : memref<512x256xbf16, #tpu.memory_space<vmem>>, vector<512x256xbf16>
    %cst_8 = arith.constant dense<0.000000e+00> : vector<8x256xf32>
    %11 = tpu.matmul %9, %10, %cst_8 {dimension_numbers = #tpu.dot_dimension_numbers<[1], [0], [0], [1], [0, 0, 1, 1], [], []>} : vector<8x512xbf16>, vector<512x256xbf16>, vector<8x256xf32> -> vector<8x256xf32>
    %c0_9 = arith.constant 0 : index
    %c0_10 = arith.constant 0 : index
    %12 = vector.load %arg5[%c0_9, %c0_10] : memref<1x256xf32, #tpu.memory_space<vmem>>, vector<1x256xf32>
    %13 = vector.broadcast %12 : vector<1x256xf32> to vector<8x256xf32>
    %14 = arith.addf %11, %13 : vector<8x256xf32>
    %cst_11 = arith.constant 0.000000e+00 : f32
    %15 = vector.broadcast %cst_11 : f32 to vector<8x256xf32>
    %16 = arith.maximumf %14, %15 : vector<8x256xf32>
    %17 = arith.truncf %16 : vector<8x256xf32> to vector<8x256xbf16>
    %c0_12 = arith.constant 0 : index
    %c0_13 = arith.constant 0 : index
    %18 = vector.load %arg6[%c0_12, %c0_13] : memref<256x128xbf16, #tpu.memory_space<vmem>>, vector<256x128xbf16>
    %cst_14 = arith.constant dense<0.000000e+00> : vector<8x128xf32>
    %19 = tpu.matmul %17, %18, %cst_14 {dimension_numbers = #tpu.dot_dimension_numbers<[1], [0], [0], [1], [0, 0, 1, 1], [], []>} : vector<8x256xbf16>, vector<256x128xbf16>, vector<8x128xf32> -> vector<8x128xf32>
    %c0_15 = arith.constant 0 : index
    %c0_16 = arith.constant 0 : index
    %20 = vector.load %arg7[%c0_15, %c0_16] : memref<1x128xf32, #tpu.memory_space<vmem>>, vector<1x128xf32>
    %21 = vector.broadcast %20 : vector<1x128xf32> to vector<8x128xf32>
    %22 = arith.addf %19, %21 : vector<8x128xf32>
    %23 = arith.truncf %22 : vector<8x128xf32> to vector<8x128xbf16>
    %c0_17 = arith.constant 0 : index
    %c0_18 = arith.constant 0 : index
    %24 = vector.load %arg8[%c0_17, %c0_18] : memref<8x128xbf16, #tpu.memory_space<vmem>>, vector<8x128xbf16>
    tpu.vector_store %arg8[%c0_17, %c0_18], %23 {strides = array<i32>} : memref<8x128xbf16, #tpu.memory_space<vmem>>, vector<8x128xbf16>,
    return
  }
  func.func @transform_0(%arg0: i32) -> (i32, i32) {
    %c0_i32 = arith.constant 0 : i32
    %c0_i32_0 = arith.constant 0 : i32
    return %arg0, %c0_i32 : i32, i32
  }
  func.func @transform_1(%arg0: i32) -> (i32, i32) {
    %c0_i32 = arith.constant 0 : i32
    %c0_i32_0 = arith.constant 0 : i32
    %c0_i32_1 = arith.constant 0 : i32
    return %c0_i32, %c0_i32_0 : i32, i32
  }
  func.func @transform_2(%arg0: i32) -> (i32, i32) {
    %c0_i32 = arith.constant 0 : i32
    %c0_i32_0 = arith.constant 0 : i32
    %c0_i32_1 = arith.constant 0 : i32
    return %c0_i32, %c0_i32_0 : i32, i32
  }
  func.func @transform_3(%arg0: i32) -> (i32, i32) {
    %c0_i32 = arith.constant 0 : i32
    %c0_i32_0 = arith.constant 0 : i32
    %c0_i32_1 = arith.constant 0 : i32
    return %c0_i32, %c0_i32_0 : i32, i32
  }
  func.func @transform_4(%arg0: i32) -> (i32, i32) {
    %c0_i32 = arith.constant 0 : i32
    %c0_i32_0 = arith.constant 0 : i32
    %c0_i32_1 = arith.constant 0 : i32
    return %c0_i32, %c0_i32_0 : i32, i32
  }
  func.func @transform_5(%arg0: i32) -> (i32, i32) {
    %c0_i32 = arith.constant 0 : i32
    %c0_i32_0 = arith.constant 0 : i32
    %c0_i32_1 = arith.constant 0 : i32
    return %c0_i32, %c0_i32_0 : i32, i32
  }
  func.func @transform_6(%arg0: i32) -> (i32, i32) {
    %c0_i32 = arith.constant 0 : i32
    %c0_i32_0 = arith.constant 0 : i32
    %c0_i32_1 = arith.constant 0 : i32
    return %c0_i32, %c0_i32_0 : i32, i32
  }
  func.func @transform_7(%arg0: i32) -> (i32, i32) {
    %c0_i32 = arith.constant 0 : i32
    %c0_i32_0 = arith.constant 0 : i32
    return %arg0, %c0_i32 : i32, i32
  }
}

</mosaic_0001>

<bundles_post_ra>
// kernel: tpu_custom_call.1
= control target key start
LH: loop header
LB: loop body
LE: loop exit
PB: predicated region body
PF: predicated region fallthrough
CT: control target
= control target key end

     0   :  { %12 = vsyncpa [#allocation3], 0  ;;  %s1397_s0 = inlined_call_operand.hbm [shape: f32[8,16], index: 0, kind: input, shape index: {}]   ;;  %s1398_s1 = inlined_call_operand.hbm [shape: bf16[16,512], index: 1, kind: input, shape index: {}]   ;;  %s1399_s2 = inlined_call_operand.vmem [shape: f32[1,512], index: 2, kind: input, shape index: {}]   ;;  %s1400_s3 = inlined_call_operand.hbm [shape: bf16[512,256], index: 3, kind: input, shape index: {}]   ;;  %s1401_s4 = inlined_call_operand.vmem [shape: f32[1,256], index: 4, kind: input, shape index: {}]   ;;  %s1402_s5 = inlined_call_operand.hbm [shape: bf16[256,128], index: 5, kind: input, shape index: {}]   ;;  %s1403_s6 = inlined_call_operand.vmem [shape: f32[1,128], index: 6, kind: input, shape index: {}]   ;;  %s1404_s7 = inlined_call_operand.hbm [shape: bf16[8,128], index: 7, kind: output, shape index: {}]  }
   0x1   :  { %13 = vsyncpa [#allocation6], 0 }
   0x2   :  { %14 = vsyncpa [#allocation9], 0 }
   0x3   :  { %15 = vsyncpa [#allocation4], 0  ;;  %s1260_s24 = smov [#allocation5]   ;;  %s1142_s28 = scalar_lea.hbm %s1398_s1, 512 }
   0x4   :  { %s31_s25 = sshll.u32 %s1260_s24, 4  ;;  %p1143_p0 = scmp.ne.s32.totalorder %s1398_s1, %s1142_s28  ;;  %s32_s25 = int_to_ptr.vmem [resolvable:$true] %s31_s25 }
   0x5   :  { %p1146_p1 = scmp.lt.u32.totalorder %s1142_s28, %s1398_s1 }
   0x7   :  { %p1148_p2 = pnand %p1146_p1, %p1143_p0 }
   0x9   :  { %1151 = shalt.err (!%p1148_p2)
}
   0xa   :  { %s1152_s10 = scalar_lea.vmem %s32_s25, 512  ;;  %p1157_p4 = scmp.lt.s32.totalorder %s32_s25, %s32_s25 }
   0xb   :  { %p1153_p3 = scmp.ne.s32.totalorder %s32_s25, %s1152_s10  ;;  %p1158_p5 = scmp.lt.s32.totalorder %s1152_s10, %s1152_s10 }
   0xd   :  { %p1159_p6 = por %p1158_p5, %p1157_p4 }
   0xf   :  { %p1160_p7 = pnand %p1159_p6, %p1153_p3 }
  0x11   :  { %1163 = shalt.err (!%p1160_p7)
}
  0x12   :  { %s1261_s11 = smov 256   ;;  %s1262_s12 = smov 16  }
  0x13   :  { %37 = dma.hbm_to_vmem [thread:$0]  %s1398_s1, 512, %s32_s25, [#allocation6], %s1261_s11, %s1261_s11, %s1262_s12  }
  0x14   :  { %s1263_s15 = smov [#allocation2]   ;;  %s1264_s17 = smov [#allocation7]  }
  0x15   :  { %s22_s16 = sshll.u32 %s1263_s15, 4  ;;  %s45_s18 = sshll.u32 %s1264_s17, 4  ;;  %s23_s16 = int_to_ptr.vmem [resolvable:$true] %s22_s16  ;;  %s46_s18 = int_to_ptr.vmem [resolvable:$true] %s45_s18 }
  0x16   :  { %s1164_s21 = scalar_lea.hbm %s1397_s0, 128 }
  0x17   :  { %p1165_p8 = scmp.ne.s32.totalorder %s1397_s0, %s1164_s21  ;;  %p1168_p9 = scmp.lt.u32.totalorder %s1164_s21, %s1397_s0 }
  0x19   :  { %p1170_p10 = pnand %p1168_p9, %p1165_p8 }
  0x1b   :  { %1173 = shalt.err (!%p1170_p10)
}
  0x1c   :  { %s1174_s1 = scalar_lea.vmem %s23_s16, 128  ;;  %p1179_p12 = scmp.lt.s32.totalorder %s23_s16, %s23_s16 }
  0x1d   :  { %p1175_p11 = scmp.ne.s32.totalorder %s23_s16, %s1174_s1  ;;  %p1180_p13 = scmp.lt.s32.totalorder %s1174_s1, %s1174_s1 }
  0x1f   :  { %p1181_p0 = por %p1180_p13, %p1179_p12 }
  0x21   :  { %p1182_p1 = pnand %p1181_p0, %p1175_p11 }
  0x23   :  { %1185 = shalt.err (!%p1182_p1)
}
  0x24   :  { %25 = dma.hbm_to_vmem [thread:$0]  %s1397_s0, 128, %s23_s16, [#allocation3]  }
  0x25   :  { %s1186_s30 = scalar_lea.hbm %s1400_s3, 8192 }
  0x26   :  { %p1187_p2 = scmp.ne.s32.totalorder %s1400_s3, %s1186_s30  ;;  %p1190_p3 = scmp.lt.u32.totalorder %s1186_s30, %s1400_s3 }
  0x28   :  { %p1192_p4 = pnand %p1190_p3, %p1187_p2 }
  0x2a   :  { %1195 = shalt.err (!%p1192_p4)
}
  0x2b   :  { %s1196_s12 = scalar_lea.vmem %s46_s18, 8192  ;;  %p1201_p6 = scmp.lt.s32.totalorder %s46_s18, %s46_s18 }
  0x2c   :  { %p1197_p5 = scmp.ne.s32.totalorder %s46_s18, %s1196_s12  ;;  %p1202_p7 = scmp.lt.s32.totalorder %s1196_s12, %s1196_s12 }
  0x2e   :  { %p1203_p8 = por %p1202_p7, %p1201_p6 }
  0x30   :  { %p1204_p9 = pnand %p1203_p8, %p1197_p5 }
  0x32   :  { %1207 = shalt.err (!%p1204_p9)
}
  0x33   :  { %s1265_s0 = smov 128   ;;  %s1266_s13 = smov 8  }
  0x34   :  { %51 = dma.hbm_to_vmem [thread:$0]  %s1400_s3, 8192, %s46_s18, [#allocation6], %s1265_s0, %s1265_s0, %s1266_s13  }
  0x35   :  { %s1267_s16 = smov [#allocation8]   ;;  %s1208_s21 = scalar_lea.hbm %s1402_s5, 2048 }
  0x36   :  { %s59_s17 = sshll.u32 %s1267_s16, 4  ;;  %p1209_p10 = scmp.ne.s32.totalorder %s1402_s5, %s1208_s21  ;;  %s60_s17 = int_to_ptr.vmem [resolvable:$true] %s59_s17 }
  0x37   :  { %p1212_p11 = scmp.lt.u32.totalorder %s1208_s21, %s1402_s5 }
  0x39   :  { %p1214_p12 = pnand %p1212_p11, %p1209_p10 }
  0x3b   :  { %1217 = shalt.err (!%p1214_p12)
}
  0x3c   :  { %s1218_s1 = scalar_lea.vmem %s60_s17, 2048  ;;  %p1223_p0 = scmp.lt.s32.totalorder %s60_s17, %s60_s17 }
  0x3d   :  { %p1219_p13 = scmp.ne.s32.totalorder %s60_s17, %s1218_s1  ;;  %p1224_p1 = scmp.lt.s32.totalorder %s1218_s1, %s1218_s1 }
  0x3f   :  { %p1225_p2 = por %p1224_p1, %p1223_p0 }
  0x41   :  { %p1226_p3 = pnand %p1225_p2, %p1219_p13 }
  0x43   :  { %1229 = shalt.err (!%p1226_p3)
}
  0x44   :  { %s1268_s3 = smov 64   ;;  %s1269_s18 = smov 4  }
  0x45   :  { %65 = dma.hbm_to_vmem [thread:$0]  %s1402_s5, 2048, %s60_s17, [#allocation9], %s1268_s3, %s1268_s3, %s1269_s18  }
  0x46   :  { %1252 = dma.done.wait [#allocation3], 128  }
  0x47   :  { %1253 = vsyncadd [#allocation3], 4294967168 }
  0x48   :  { %1254 = dma.done.wait [#allocation6], 8704  }
  0x49   :  { %1255 = vsyncadd [#allocation6], 4294958592 }
  0x4a   :  { %1256 = dma.done.wait [#allocation9], 2048  }
  0x4b   :  { %1257 = vsyncadd [#allocation9], 4294965248  ;;  %v1270_v0 = vmov 0   ;;  %v1024_v1 = vld [vmem:[#allocation5 + $0x4] ss:$16 sps:$4 sm:$0xff]   ;;  %v81_v3 = vld [vmem:[#allocation2] sm:$0xff] }
  0x4c   :  { %165 = vmatprep.mubr.bf16.mxu0 %v1270_v0  ;;  %v1026_v2 = vld [vmem:[#allocation5] ss:$16 sps:$4 sm:$0xff]   ;;  %133 = vmatprep.subr.bf16.mxu0 %v1024_v1  ;;  %v82_v4 = vpack.c.bf16 %v81_v3, %v81_v3  ;;  %v1027_v5 = vld [vmem:[#allocation5 + $0x8] ss:$16 sps:$4 sm:$0xff]   ;;  %v1029_v6 = vld [vmem:[#allocation5 + $0xc] ss:$16 sps:$4 sm:$0xff]  }
  0x4d   :  { %134 = vmatpush1.bf16.msra.mxu0 %v1026_v2  ;;  %vm129_vm0 = vcmask 130048   ;;  %v1030_v7 = vld [vmem:[#allocation7 + $0x4] ss:$8 sps:$4 sm:$0xff]   ;;  %v1032_v8 = vld [vmem:[#allocation7] ss:$8 sps:$4 sm:$0xff]   ;;  %s1271_s8 = smov [#allocation10]  }
  0x4e   :  { %174 = vmatprep.subr.bf16.mxu0 %v1029_v6  ;;  %619 = vmatprep.subr.bf16.mxu1 %v1030_v7  ;;  %v1033_v9 = vld [vmem:[#allocation7 + $0x14] ss:$8 sps:$4 sm:$0xff]   ;;  %v1035_v10 = vld [vmem:[#allocation7 + $0x10] ss:$8 sps:$4 sm:$0xff]   ;;  %v1036_v11 = vld [vmem:[#allocation7 + $0x24] ss:$8 sps:$4 sm:$0xff]  }
  0x4f   :  { %620 = vmatpush1.bf16.msra.mxu1 %v1032_v8  ;;  %v1040_v12 = vld [vmem:[#allocation7 + $0x104] ss:$8 sps:$4 sm:$0xff]   ;;  %v1038_v13 = vld [vmem:[#allocation7 + $0x100] ss:$8 sps:$4 sm:$0xff]   ;;  %v1042_v15 = vld [vmem:[#allocation7 + $0x34] ss:$8 sps:$4 sm:$0xff]   ;;  %v89_v8 = vlaneseq }
  0x50   :  { %903 = vmatmul.mubr.msk.bf16.vlgmr.msra.gmra.mrb[0].mxu0 %vm129_vm0, %v82_v4  ;;  %621 = vmatprep.subr.bf16.mxu1 %v1033_v9  ;;  %v1041_v14 = vld [vmem:[#allocation7 + $0x20] ss:$8 sps:$4 sm:$0xff]   ;;  %v1046_v16 = vld [vmem:[#allocation7 + $0x114] ss:$8 sps:$4 sm:$0xff]   ;;  %v1047_v17 = vld [vmem:[#allocation7 + $0x30] ss:$8 sps:$4 sm:$0xff]  }
  0x51   :  { %175 = vmatpush1.bf16.msra.mxu0 %v1027_v5  ;;  %206 = vmatprep.mubr.bf16.mxu0 %v1270_v0  ;;  %v1044_v18 = vld [vmem:[#allocation7 + $0x110] ss:$8 sps:$4 sm:$0xff]   ;;  %v1048_v19 = vld [vmem:[#allocation7 + $0x44] ss:$8 sps:$4 sm:$0xff]   ;;  %v1050_v21 = vld [vmem:[#allocation7 + $0x120] ss:$8 sps:$4 sm:$0xff]  }
  0x52   :  { %660 = vmatprep.subr.bf16.mxu0 %v1040_v12  ;;  %v1052_v20 = vld [vmem:[#allocation7 + $0x124] ss:$8 sps:$4 sm:$0xff]   ;;  %v1053_v22 = vld [vmem:[#allocation7 + $0x40] ss:$8 sps:$4 sm:$0xff]   ;;  %v1054_v23 = vld [vmem:[#allocation7 + $0x54] ss:$8 sps:$4 sm:$0xff]  }
  0x53   :  { %622 = vmatpush1.bf16.msra.mxu1 %v1035_v10  ;;  %v1058_v24 = vld [vmem:[#allocation7 + $0x134] ss:$8 sps:$4 sm:$0xff]   ;;  %v1059_v25 = vld [vmem:[#allocation7 + $0x50] ss:$8 sps:$4 sm:$0xff]   ;;  %v1060_v27 = vld [vmem:[#allocation7 + $0x64] ss:$8 sps:$4 sm:$0xff]  }
  0x54   :  { %623 = vmatprep.subr.bf16.mxu1 %v1036_v11  ;;  %v1056_v26 = vld [vmem:[#allocation7 + $0x130] ss:$8 sps:$4 sm:$0xff]   ;;  %v1064_v28 = vld [vmem:[#allocation7 + $0x144] ss:$8 sps:$4 sm:$0xff]   ;;  %v1062_v29 = vld [vmem:[#allocation7 + $0x140] ss:$8 sps:$4 sm:$0xff]  }
  0x55   :  { %v1065_v30 = vld [vmem:[#allocation7 + $0x60] ss:$8 sps:$4 sm:$0xff]   ;;  %v1066_v31 = vld [vmem:[#allocation7 + $0x74] ss:$8 sps:$4 sm:$0xff]   ;;  %v1071_v33 = vld [vmem:[#allocation7 + $0x70] ss:$8 sps:$4 sm:$0xff]  }
  0x56   :  { %v1070_v32 = vld [vmem:[#allocation7 + $0x154] ss:$8 sps:$4 sm:$0xff]   ;;  %v1068_v34 = vld [vmem:[#allocation7 + $0x150] ss:$8 sps:$4 sm:$0xff]   ;;  %v1072_v35 = vld [vmem:[#allocation7 + $0x84] ss:$8 sps:$4 sm:$0xff]  }
  0x57   :  { %624 = vmatpush1.bf16.msra.mxu1 %v1041_v14  ;;  %v1076_v36 = vld [vmem:[#allocation7 + $0x164] ss:$8 sps:$4 sm:$0xff]   ;;  %v1074_v37 = vld [vmem:[#allocation7 + $0x160] ss:$8 sps:$4 sm:$0xff]   ;;  %v1078_v39 = vld [vmem:[#allocation7 + $0x94] ss:$8 sps:$4 sm:$0xff]  }
  0x58   :  { %904 = vmatmul.mubr.msk.bf16.vlgmr.msra.gmra.mrb[4].mxu0 %vm129_vm0, %v82_v4  ;;  %625 = vmatprep.subr.bf16.mxu1 %v1042_v15  ;;  %v1077_v38 = vld [vmem:[#allocation7 + $0x80] ss:$8 sps:$4 sm:$0xff]   ;;  %v1082_v40 = vld [vmem:[#allocation7 + $0x174] ss:$8 sps:$4 sm:$0xff]   ;;  %v1080_v41 = vld [vmem:[#allocation7 + $0x170] ss:$8 sps:$4 sm:$0xff]  }
  0x59   :  { %661 = vmatpush1.bf16.msra.mxu0 %v1038_v13  ;;  %v1083_v42 = vld [vmem:[#allocation7 + $0x90] ss:$8 sps:$4 sm:$0xff]   ;;  %v1084_v43 = vld [vmem:[#allocation7 + $0xa4] ss:$8 sps:$4 sm:$0xff]   ;;  %v1089_v45 = vld [vmem:[#allocation7 + $0xa0] ss:$8 sps:$4 sm:$0xff]  }
  0x5a   :  { %662 = vmatprep.subr.bf16.mxu0 %v1046_v16  ;;  %v1088_v44 = vld [vmem:[#allocation7 + $0x184] ss:$8 sps:$4 sm:$0xff]   ;;  %v1086_v46 = vld [vmem:[#allocation7 + $0x180] ss:$8 sps:$4 sm:$0xff]   ;;  %v1090_v47 = vld [vmem:[#allocation7 + $0xb4] ss:$8 sps:$4 sm:$0xff]  }
  0x5b   :  { %626 = vmatpush1.bf16.msra.mxu1 %v1047_v17  ;;  %v1094_v48 = vld [vmem:[#allocation7 + $0x194] ss:$8 sps:$4 sm:$0xff]   ;;  %v1095_v49 = vld [vmem:[#allocation7 + $0xb0] ss:$8 sps:$4 sm:$0xff]   ;;  %v1096_v51 = vld [vmem:[#allocation7 + $0xc4] ss:$8 sps:$4 sm:$0xff]  }
  0x5c   :  { %627 = vmatprep.subr.bf16.mxu1 %v1048_v19  ;;  %v1092_v50 = vld [vmem:[#allocation7 + $0x190] ss:$8 sps:$4 sm:$0xff]   ;;  %v1100_v52 = vld [vmem:[#allocation7 + $0x1a4] ss:$8 sps:$4 sm:$0xff]   ;;  %v1101_v53 = vld [vmem:[#allocation7 + $0xc0] ss:$8 sps:$4 sm:$0xff]  }
  0x5d   :  { %663 = vmatpush1.bf16.msra.mxu0 %v1044_v18  ;;  %v1098_v54 = vld [vmem:[#allocation7 + $0x1a0] ss:$8 sps:$4 sm:$0xff]   ;;  %v1102_v55 = vld [vmem:[#allocation7 + $0xd4] ss:$8 sps:$4 sm:$0xff]   ;;  %v1107_v57 = vld [vmem:[#allocation7 + $0xd0] ss:$8 sps:$4 sm:$0xff]  }
  0x5e   :  { %664 = vmatprep.subr.bf16.mxu0 %v1052_v20  ;;  %v1106_v56 = vld [vmem:[#allocation7 + $0x1b4] ss:$8 sps:$4 sm:$0xff]   ;;  %v1104_v58 = vld [vmem:[#allocation7 + $0x1b0] ss:$8 sps:$4 sm:$0xff]   ;;  %v1108_v59 = vld [vmem:[#allocation7 + $0xe4] ss:$8 sps:$4 sm:$0xff]  }
  0x5f   :  { %628 = vmatpush1.bf16.msra.mxu1 %v1053_v22  ;;  %v1112_v60 = vld [vmem:[#allocation7 + $0x1c4] ss:$8 sps:$4 sm:$0xff]   ;;  %v1110_v61 = vld [vmem:[#allocation7 + $0x1c0] ss:$8 sps:$4 sm:$0xff]   ;;  %v1114_v63 = vld [vmem:[#allocation7 + $0xf4] ss:$8 sps:$4 sm:$0xff]  }
  0x60   :  { %629 = vmatprep.subr.bf16.mxu1 %v1054_v23  ;;  %v1113_v62 = vld [vmem:[#allocation7 + $0xe0] ss:$8 sps:$4 sm:$0xff]   ;;  %v1118_v0 = vld [vmem:[#allocation7 + $0x1d4] ss:$8 sps:$4 sm:$0xff]   ;;  %v1116_v1 = vld [vmem:[#allocation7 + $0x1d0] ss:$8 sps:$4 sm:$0xff]  }
  0x61   :  { %665 = vmatpush1.bf16.msra.mxu0 %v1050_v21  ;;  %v1119_v2 = vld [vmem:[#allocation7 + $0xf0] ss:$8 sps:$4 sm:$0xff]   ;;  %v1122_v3 = vld [vmem:[#allocation7 + $0x1e4] ss:$8 sps:$4 sm:$0xff]   ;;  %v1120_v4 = vld [vmem:[#allocation7 + $0x1e0] ss:$8 sps:$4 sm:$0xff]  }
  0x62   :  { %666 = vmatprep.subr.bf16.mxu0 %v1058_v24  ;;  %v1125_v5 = vld [vmem:[#allocation7 + $0x1f4] ss:$8 sps:$4 sm:$0xff]   ;;  %v1123_v6 = vld [vmem:[#allocation7 + $0x1f0] ss:$8 sps:$4 sm:$0xff]   ;;  %v1126_v7 = vld [vmem:[#allocation8 + $0x40] sm:$0xff]   ;;  %v1362_v9 = vshrl.u32 %v89_v8, 7 }
  0x63   :  { %630 = vmatpush1.bf16.msra.mxu1 %v1059_v25  ;;  %v87_v11 = vld [vmem:[%s1399_s2] sm:$0xf]  ;;  %s888_s9 = sshll.u32 %s1271_s8, 4  ;;  %s889_s9 = int_to_ptr.vmem [resolvable:$true] %s888_s9 }
  0x64   :  { %631 = vmatprep.subr.bf16.mxu1 %v1060_v27  ;;  %v91_v10 = vsub.s32 0, %v1362_v9  ;;  %v95_v12 = vsub.s32 1, %v1362_v9  ;;  %v99_v18 = vsub.s32 2, %v1362_v9  ;;  %v103_v21 = vsub.s32 3, %v1362_v9  ;;  %v969_v9 = vld [vmem:[%s1403_s6] ss:$0 sm:$0xff]  ;;  %p1235_p5 = scmp.lt.s32.totalorder %s889_s9, %s889_s9 }
  0x65   :  { %667 = vmatpush1.bf16.msra.mxu0 %v1056_v26  ;;  %s1230_s10 = scalar_lea.vmem %s889_s9, 64 }
  0x66   :  { %668 = vmatprep.subr.bf16.mxu0 %v1064_v28  ;;  %v92_v13 = vrot.slane %v87_v11, %v91_v10  ;;  %v96_v14 = vrot.slane %v87_v11, %v95_v12  ;;  %v100_v25 = vrot.slane %v87_v11, %v99_v18  ;;  %v104_v27 = vrot.slane %v87_v11, %v103_v21  ;;  %v1127_v28 = vld [vmem:[#allocation8] sm:$0xff]   ;;  %p1231_p4 = scmp.ne.s32.totalorder %s889_s9, %s1230_s10  ;;  %p1236_p6 = scmp.lt.s32.totalorder %s1230_s10, %s1230_s10 }
  0x67   :  { %632 = vmatpush1.bf16.msra.mxu1 %v1065_v30  ;;  %v1128_v30 = vld [vmem:[#allocation8 + $0x48] sm:$0xff]  }
  0x68   :  { %633 = vmatprep.subr.bf16.mxu1 %v1066_v31  ;;  %p1237_p7 = por %p1236_p6, %p1235_p5 }
  0x69   :  { %669 = vmatpush1.bf16.msra.mxu0 %v1062_v29 }
  0x6a   :  { %670 = vmatprep.subr.bf16.mxu0 %v1070_v32  ;;  %p1238_p8 = pnand %p1237_p7, %p1231_p4 }
  0x6b   :  { %634 = vmatpush1.bf16.msra.mxu1 %v1071_v33 }
  0x6c   :  { %635 = vmatprep.subr.bf16.mxu1 %v1072_v35 }
  0x6d   :  { %671 = vmatpush1.bf16.msra.mxu0 %v1068_v34 }
  0x6e   :  { %672 = vmatprep.subr.bf16.mxu0 %v1076_v36  ;;  %v1129_v36 = vld [vmem:[#allocation8 + $0x8] sm:$0xff]  }
  0x6f   :  { %636 = vmatpush1.bf16.msra.mxu1 %v1077_v38 }
  0x70   :  { %637 = vmatprep.subr.bf16.mxu1 %v1078_v39  ;;  %v1130_v39 = vld [vmem:[#allocation8 + $0x50] sm:$0xff]  }
  0x71   :  { %673 = vmatpush1.bf16.msra.mxu0 %v1074_v37 }
  0x72   :  { %674 = vmatprep.subr.bf16.mxu0 %v1082_v40 }
  0x73   :  { %638 = vmatpush1.bf16.msra.mxu1 %v1083_v42  ;;  %v1131_v42 = vld [vmem:[#allocation8 + $0x10] sm:$0xff]  }
  0x74   :  { %639 = vmatprep.subr.bf16.mxu1 %v1084_v43 }
  0x75   :  { %675 = vmatpush1.bf16.msra.mxu0 %v1080_v41 }
  0x76   :  { %676 = vmatprep.subr.bf16.mxu0 %v1088_v44  ;;  %v1132_v44 = vld [vmem:[#allocation8 + $0x58] sm:$0xff]  }
  0x77   :  { %640 = vmatpush1.bf16.msra.mxu1 %v1089_v45  ;;  %v1133_v45 = vld [vmem:[#allocation8 + $0x18] sm:$0xff]  }
  0x78   :  { %641 = vmatprep.subr.bf16.mxu1 %v1090_v47  ;;  %v1135_v47 = vld [vmem:[#allocation8 + $0x20] sm:$0xff]  }
  0x79   :  { %677 = vmatpush1.bf16.msra.mxu0 %v1086_v46  ;;  %v1134_v46 = vld [vmem:[#allocation8 + $0x60] sm:$0xff]  }
  0x7a   :  { %678 = vmatprep.subr.bf16.mxu0 %v1094_v48  ;;  %v1136_v48 = vld [vmem:[#allocation8 + $0x68] sm:$0xff]  }
  0x7b   :  { %642 = vmatpush1.bf16.msra.mxu1 %v1095_v49  ;;  %v1137_v49 = vld [vmem:[#allocation8 + $0x28] sm:$0xff]  }
  0x7c   :  { %643 = vmatprep.subr.bf16.mxu1 %v1096_v51  ;;  %v1139_v51 = vld [vmem:[#allocation8 + $0x30] sm:$0xff]  }
  0x7d   :  { %679 = vmatpush1.bf16.msra.mxu0 %v1092_v50  ;;  %v1138_v50 = vld [vmem:[#allocation8 + $0x70] sm:$0xff]  }
  0x7e   :  { %680 = vmatprep.subr.bf16.mxu0 %v1100_v52  ;;  %v1140_v52 = vld [vmem:[#allocation8 + $0x78] sm:$0xff]  }
  0x7f   :  { %644 = vmatpush1.bf16.msra.mxu1 %v1101_v53  ;;  %v1141_v53 = vld [vmem:[#allocation8 + $0x38] sm:$0xff]  }
  0x80   :  { %645 = vmatprep.subr.bf16.mxu1 %v1102_v55 }
  0x81   :  { %681 = vmatpush1.bf16.msra.mxu0 %v1098_v54  ;;  %v287_v54 = vld [vmem:[%s1401_s4] sm:$0x3] }
  0x82   :  { %682 = vmatprep.subr.bf16.mxu0 %v1106_v56 }
  0x83   :  { %646 = vmatpush1.bf16.msra.mxu1 %v1107_v57 }
  0x84   :  { %647 = vmatprep.subr.bf16.mxu1 %v1108_v59 }
  0x85   :  { %683 = vmatpush1.bf16.msra.mxu0 %v1104_v58  ;;  %v292_v58 = vrot.slane %v287_v54, %v91_v10 }
  0x86   :  { %684 = vmatprep.subr.bf16.mxu0 %v1112_v60  ;;  %v296_v60 = vrot.slane %v287_v54, %v95_v12 }
  0x87   :  { %648 = vmatpush1.bf16.msra.mxu1 %v1113_v62 }
  0x88   :  { %649 = vmatprep.subr.bf16.mxu1 %v1114_v63 }
  0x89   :  { %685 = vmatpush1.bf16.msra.mxu0 %v1110_v61 }
  0x8a   :  { %686 = vmatprep.subr.bf16.mxu0 %v1118_v0 }
  0x8b   :  { %650 = vmatpush1.bf16.msra.mxu1 %v1119_v2 }
  0x8c   :  { %986 = vmatprep.subr.bf16.mxu1 %v1126_v7 }
  0x8d   :  { %687 = vmatpush1.bf16.msra.mxu0 %v1116_v1 }
  0x8e   :  { %688 = vmatprep.subr.bf16.mxu0 %v1122_v3 }
  0x91   :  { %689 = vmatpush1.bf16.msra.mxu0 %v1120_v4 }
  0x92   :  { %690 = vmatprep.subr.bf16.mxu0 %v1125_v5 }
  0x95   :  { %691 = vmatpush1.bf16.msra.mxu0 %v1123_v6 }
 0x123   :  { %v167_v15 = vpop.f32.mrb[0].mxu0 }
 0x124   :  { %v168_v16 = vadd.f32 %v167_v15, %v92_v13  ;;  %v169_v17 = vpop.f32.mrb[1].mxu0 }
 0x125   :  { %v170_v19 = vadd.f32 %v169_v17, %v96_v14  ;;  %v171_v20 = vpop.f32.mrb[2].mxu0 }
 0x126   :  { %v215_v22 = vmax.f32 %v168_v16, 0.0  ;;  %v172_v23 = vpop.f32.mrb[3].mxu0 }
 0x127   :  { %v216_v24 = vmax.f32 %v170_v19, 0.0 }
 0x128   :  { %v219_v29 = vpack.c.bf16 %v215_v22, %v215_v22 }
 0x129   :  { %v220_v26 = vpack.c.bf16 %v216_v24, %v216_v24 }
 0x12b   :  { %v208_v31 = vpop.f32.mrb[4].mxu0  ;;  %651 = vmatprep.mubr.bf16.mxu1 %v220_v26 }
 0x12c   :  { %v209_v32 = vadd.f32 %v208_v31, %v100_v25  ;;  %v210_v33 = vpop.f32.mrb[5].mxu0  ;;  %652 = vmatmul.mubr.bf16.vlgmr.msra.gmra.mrb[0].mxu1 %v219_v29 }
 0x12d   :  { %v211_v34 = vadd.f32 %v210_v33, %v104_v27  ;;  %v212_v35 = vpop.f32.mrb[6].mxu0  ;;  %987 = vmatpush3.bf16.msra.mxu1 %v1127_v28 }
 0x12e   :  { %v217_v37 = vmax.f32 %v209_v32, 0.0  ;;  %v213_v38 = vpop.f32.mrb[7].mxu0  ;;  %988 = vmatprep.subr.bf16.mxu1 %v1128_v30 }
 0x12f   :  { %v218_v40 = vmax.f32 %v211_v34, 0.0 }
 0x130   :  { %v221_v43 = vpack.c.bf16 %v217_v37, %v217_v37 }
 0x131   :  { %v222_v41 = vpack.c.bf16 %v218_v40, %v218_v40  ;;  %989 = vmatpush3.bf16.msra.mxu1 %v1129_v36 }
 0x132   :  { %990 = vmatprep.subr.bf16.mxu1 %v1130_v39 }
 0x133   :  { %692 = vmatprep.mubr.bf16.mxu0 %v222_v41 }
 0x134   :  { %693 = vmatmul.mubr.bf16.vlgmr.msra.gmra.mrb[8].mxu0 %v221_v43 }
 0x135   :  { %991 = vmatpush3.bf16.msra.mxu1 %v1131_v42 }
 0x136   :  { %992 = vmatprep.subr.bf16.mxu1 %v1132_v44 }
 0x139   :  { %993 = vmatpush3.bf16.msra.mxu1 %v1133_v45 }
 0x13a   :  { %994 = vmatprep.subr.bf16.mxu1 %v1134_v46 }
 0x13d   :  { %995 = vmatpush3.bf16.msra.mxu1 %v1135_v47 }
 0x13e   :  { %996 = vmatprep.subr.bf16.mxu1 %v1136_v48 }
 0x141   :  { %997 = vmatpush3.bf16.msra.mxu1 %v1137_v49 }
 0x142   :  { %998 = vmatprep.subr.bf16.mxu1 %v1138_v50 }
 0x145   :  { %999 = vmatpush3.bf16.msra.mxu1 %v1139_v51 }
 0x146   :  { %1000 = vmatprep.subr.bf16.mxu1 %v1140_v52 }
 0x149   :  { %1001 = vmatpush3.bf16.msra.mxu1 %v1141_v53 }
 0x1ff   :  { %v653_v55 = vpop.f32.mrb[0].mxu1 }
 0x200   :  { %v655_v56 = vpop.f32.mrb[1].mxu1  ;;  %v654_v61 = vadd.f32 %v653_v55, %v292_v58 }
 0x201   :  { %v657_v57 = vpop.f32.mrb[2].mxu1  ;;  %v656_v62 = vadd.f32 %v655_v56, %v296_v60 }
 0x202   :  { %v658_v59 = vpop.f32.mrb[3].mxu1 }
 0x207   :  { %v694_v63 = vpop.f32.mrb[8].mxu0 }
 0x208   :  { %v695_v0 = vadd.f32 %v694_v63, %v654_v61  ;;  %v696_v1 = vpop.f32.mrb[9].mxu0 }
 0x209   :  { %v697_v2 = vadd.f32 %v696_v1, %v656_v62  ;;  %v698_v3 = vpop.f32.mrb[10].mxu0 }
 0x20a   :  { %v701_v4 = vmax.f32 %v695_v0, 0.0  ;;  %v699_v5 = vpop.f32.mrb[11].mxu0 }
 0x20b   :  { %v702_v6 = vmax.f32 %v697_v2, 0.0 }
 0x20c   :  { %v703_v8 = vpack.c.bf16 %v701_v4, %v701_v4 }
 0x20d   :  { %v704_v7 = vpack.c.bf16 %v702_v6, %v702_v6 }
 0x20f   :  { %872 = vmatprep.mubr.bf16.mxu1 %v704_v7 }
 0x210   :  { %873 = vmatmul.mubr.bf16.vlgmr.msra.gmra.mrb[4].mxu1 %v703_v8 }
 0x2e3   :  { %v1002_v11 = vpop.f32.mrb[4].mxu1 }
 0x2e4   :  { %v1003_v10 = vpop.f32.mrb[5].mxu1 }
 0x2e5   :  { %v1004_v12 = vadd.f32 %v1003_v10, %v1002_v11  ;;  %v1005_v13 = vpop.f32.mrb[6].mxu1 }
 0x2e6   :  { %v1006_v14 = vpop.f32.mrb[7].mxu1 }
 0x2e7   :  { %v875_v15 = vadd.f32 %v1004_v12, %v969_v9 }
 0x2e9   :  { %v880_v16 = vpack.c.bf16 %v875_v15, %v875_v15 }
 0x2eb   :  { %881 = vst [vmem:[#allocation10] sm:$0xf] %v880_v16 }
 0x2ec   :  { %1241 = shalt.err (!%p1238_p8)
}
 0x2ed   :  { %s1242_s6 = scalar_lea.hbm %s1404_s7, 64 }
 0x2ee   :  { %p1243_p9 = scmp.ne.s32.totalorder %s1404_s7, %s1242_s6  ;;  %p1246_p10 = scmp.lt.u32.totalorder %s1242_s6, %s1404_s7 }
 0x2f0   :  { %p1248_p11 = pnand %p1246_p10, %p1243_p9 }
 0x2f2   :  { %1251 = shalt.err (!%p1248_p11)
}
 0x2f3   :  { %891 = dma.vmem_to_hbm [thread:$0]  %s889_s9, 64, %s1404_s7, [#allocation4]  }
 0x2f4   :  { %1258 = dma.done.wait [#allocation4], 64  }
 0x2f5   :  { %1259 = vsyncadd [#allocation4], 4294967232 }
 0x2f6   :  { %895 = vsyncpa [#allocation3], 1 }
 0x2f7   :  { %896 = vsyncpa [#allocation6], 1 }
 0x2f8   :  { %897 = vsyncpa [#allocation9], 1 }
 0x2f9   :  { %898 = vsyncpa [#allocation4], 1 }

</bundles_post_ra>
